<compile_context>
chip_gen: v5e
topology: v5e:2x2
jax: 0.10.0
libtpu: 0.0.40
codegen_flags: <defaults>
</compile_context>

<pallas_src>
import numpy as np

import jax
import jax.numpy as jnp
from jax.experimental import pallas as pl
from jax.experimental.pallas import tpu as pltpu

LANE = 128          # TPU vreg lane width
SUBLANE_BF16 = 16   # bf16 sublane pack (2 rows per 32-bit sublane)


def _round_up(n, m):
    return ((n + m - 1) // m) * m


def _auto_tm(batch):
    """Pick the batch tile.

    Small B: one tile of round_up(B, 16) rows (no 16x padding waste).
    Larger B: split into >= 2 grid steps (megacore sharding on v7x), capped
    at 128 rows (fills MXU rows).
    """
    if batch <= SUBLANE_BF16:
        return SUBLANE_BF16
    two_step = _round_up((batch + 1) // 2, SUBLANE_BF16)
    return min(128, two_step)


def _make_mlp_kernel(num_layers, act_flags):
    """Fused MLP kernel.

    Ref layout: (x_ref, w0, b0, w1, b1, ..., out_ref).
      x_ref : (TM, Din_pad)       f32  (cast to bf16 in-kernel on the VPU)
      w_i   : (Din_pad, Dout_pad) bf16 (VMEM-resident, single-buffered)
      b_i   : (1, Dout_pad)       f32
      out   : (TM, Dout_pad)      f32 or bf16
    act_flags[i] == True -> ReLU after layer i.
    """

    def kernel(*refs):
        x_ref = refs[0]
        out_ref = refs[-1]
        prm = refs[1:-1]

        h = x_ref[...].astype(jnp.bfloat16)  # MXU-native operand dtype
        for i in range(num_layers):
            w = prm[2 * i][...]        # bf16
            b = prm[2 * i + 1][...]    # f32 (1, Dout_pad) — broadcast add
            y = jnp.dot(h, w, preferred_element_type=jnp.float32) + b
            if act_flags[i]:
                y = jnp.maximum(y, 0.0)
            if i + 1 < num_layers:
                h = y.astype(jnp.bfloat16)   # next matmul input stays bf16
            else:
                out_ref[...] = y.astype(out_ref.dtype)

    return kernel


def prepare_encoder_mlp_params(params):
    """One-time prep: pad feature dims to 128-multiples, weights -> bf16.

    Padded regions are built from zeros, so the zero-padded-lane invariant
    (padded weight rows/cols and bias lanes exactly zero) holds by
    construction and padded lanes of every layer's output stay exactly zero.
    Returns list of (W_pad bf16 (Din_p, Dout_p), b_pad f32 (1, Dout_p)).

    Note: keep bf16 (not int8/fp8) — bf16 is the full-rate common denominator
    across v5e/v6e/v7x MXUs (v7x dropped int8).
    """
    out = []
    for w, b in params:
        d_in, d_out = w.shape
        d_in_p, d_out_p = _round_up(d_in, LANE), _round_up(d_out, LANE)
        w_p = jnp.zeros((d_in_p, d_out_p), jnp.bfloat16)
        w_p = w_p.at[:d_in, :d_out].set(w.astype(jnp.bfloat16))
        b_p = jnp.zeros((1, d_out_p), jnp.float32)
        b_p = b_p.at[:, :d_out].set(b.reshape(1, d_out).astype(jnp.float32))
        out.append((w_p, b_p))
    return out


def encoder_mlp_pallas(x, padded_params, act_flags, out_dim, *, tm=None,
                       out_dtype=jnp.float32):
    """Fused EncoderMLP forward.

    Args:
      x: (B, input_dim) f32.
      padded_params: output of prepare_encoder_mlp_params.
      act_flags: tuple[bool] — ReLU after layer i.
      out_dim: true (unpadded) output dim = 2*latent_dim.
      tm: batch tile (rows per grid step); None -> auto from B.
      out_dtype: kernel output dtype (bf16 halves writeback if acceptable).
    Returns:
      (B, out_dim) out_dtype array.
    """
    num_layers = len(padded_params)
    assert len(act_flags) == num_layers
    B, d_in = x.shape
    d_in_p = padded_params[0][0].shape[0]
    d_out_p = padded_params[-1][0].shape[1]
    assert d_in <= d_in_p and out_dim <= d_out_p

    if tm is None:
        tm = _auto_tm(B)
    tm = max(SUBLANE_BF16, _round_up(tm, SUBLANE_BF16))
    b_pad = _round_up(max(B, 1), tm)

    # Single pad (only if needed), no dtype round-trip in HBM: x stays f32
    # and the bf16 cast happens in-kernel on the VPU.
    if b_pad != B or d_in_p != d_in:
        x_p = jnp.pad(x, ((0, b_pad - B), (0, d_in_p - d_in)))
    else:
        x_p = x

    kernel = _make_mlp_kernel(num_layers, act_flags)
    grid = (b_pad // tm,)

    flat_inputs = [x_p]
    for w, b in padded_params:
        flat_inputs.append(w)
        flat_inputs.append(b)

    def build_in_specs(weight_mode):
        specs = [pl.BlockSpec((tm, d_in_p), lambda i: (i, 0))]
        for w, b in padded_params:
            if weight_mode is None:
                specs.append(pl.BlockSpec(w.shape, lambda i: (0, 0)))
                specs.append(pl.BlockSpec(b.shape, lambda i: (0, 0)))
            else:
                # Constant block index -> weights stay VMEM-resident; a
                # single buffer is enough (double-buffering them wastes VMEM).
                specs.append(pl.BlockSpec(w.shape, lambda i: (0, 0),
                                          pipeline_mode=weight_mode))
                specs.append(pl.BlockSpec(b.shape, lambda i: (0, 0),
                                          pipeline_mode=weight_mode))
        return specs

    out_spec = pl.BlockSpec((tm, d_out_p), lambda i: (i, 0))

    # Explicit VMEM budget: resident weights/biases (single-buffered) +
    # double-buffered x/out tiles + intermediate/compile scratch headroom.
    weight_bytes = sum(w.size * w.dtype.itemsize + b.size * b.dtype.itemsize
                       for w, b in padded_params)
    io_bytes = (2 * tm * d_in_p * x_p.dtype.itemsize
                + 2 * tm * d_out_p * np.dtype(out_dtype).itemsize)
    inter_bytes = sum(tm * w.shape[1] * 6 for w, _ in padded_params)
    vmem_limit = int(min(100 << 20,
                         max(8 << 20,
                             2 * (weight_bytes + io_bytes + inter_bytes))))

    def run(weight_mode):
        return pl.pallas_call(
            kernel,
            out_shape=jax.ShapeDtypeStruct((b_pad, d_out_p), out_dtype),
            grid=grid,
            in_specs=build_in_specs(weight_mode),
            out_specs=out_spec,
            compiler_params=pltpu.CompilerParams(
                dimension_semantics=("parallel",),  # batch across v7x TCs
                vmem_limit_bytes=vmem_limit,
            ),
        )(*flat_inputs)

    try:
        out = jax.block_until_ready(run(pl.Buffered(1)))
    except Exception:
        # Fallback if this JAX build rejects buffer_count=1 for resident
        # blocks: default double-buffering (correct, slightly more VMEM).
        out = run(None)

    return out[:B, :out_dim]


def init_encoder_mlp_params(key, input_dim, hidden_dim, latent_dim, depth):
    """Deterministic init matching EncoderMLP's layer shapes (f32, unpadded).

    Layer dims: input_dim -> hidden_dim -> hidden_dim/2 -> ... -> 2*latent_dim
    Returns (params [(W (d_in,d_out), b (1,d_out))...], act_flags).
    """
    assert hidden_dim // 2 ** (depth - 1) >= 1
    dims = [input_dim, hidden_dim]
    for i in range(1, depth):
        dims.append(hidden_dim // 2 ** i)
    dims.append(2 * latent_dim)

    num_layers = len(dims) - 1
    act_flags = tuple(i < num_layers - 1 for i in range(num_layers))

    params = []
    for i in range(num_layers):
        d_in, d_out = dims[i], dims[i + 1]
        key, kw, kb = jax.random.split(key, 3)
        bound = 1.0 / jnp.sqrt(jnp.float32(d_in))
        w = jax.random.uniform(kw, (d_in, d_out), jnp.float32, -bound, bound)
        b = jax.random.uniform(kb, (1, d_out), jnp.float32, -bound, bound)
        params.append((w, b))
    return params, act_flags


def encoder_mlp_ref(x, params, act_flags):
    """Pure-JAX reference mirroring the kernel numerics.

    bf16-rounded operands, f32 accumulation, bias+ReLU in f32, intermediate
    activations rounded to bf16 — same as the kernel.  (Do not tighten the
    tolerance below ~1e-3: MXU accumulation order may differ slightly.)
    """
    num_layers = len(params)
    h = x.astype(jnp.bfloat16).astype(jnp.float32)
    for i, ((w, b), act) in enumerate(zip(params, act_flags)):
        wf = w.astype(jnp.bfloat16).astype(jnp.float32)
        h = jnp.dot(h, wf, preferred_element_type=jnp.float32) + b.astype(
            jnp.float32
        )
        if act:
            h = jnp.maximum(h, 0.0)
        if i + 1 < num_layers:
            h = h.astype(jnp.bfloat16).astype(jnp.float32)
    return h


if __name__ == "__main__":
    # Small config consistent with the module:
    #   input_dim=32, hidden_dim=32, latent_dim=8, depth=2, act_fn=ReLU
    B, INPUT_DIM, HIDDEN_DIM, LATENT_DIM, DEPTH = 8, 32, 32, 8, 2

    key = jax.random.PRNGKey(0)
    key, kx = jax.random.split(key)
    x = jax.random.normal(kx, (B, INPUT_DIM), jnp.float32)

    params, act_flags = init_encoder_mlp_params(
        key, INPUT_DIM, HIDDEN_DIM, LATENT_DIM, DEPTH
    )
    padded_params = prepare_encoder_mlp_params(params)

    out = encoder_mlp_pallas(
        x, padded_params, act_flags, out_dim=2 * LATENT_DIM
    )
    out = jax.block_until_ready(out)

    ref = encoder_mlp_ref(x, params, act_flags)
    assert out.shape == (B, 2 * LATENT_DIM), out.shape
    assert jnp.allclose(out, ref, atol=1e-3, rtol=1e-3), "mismatch vs reference"

    print("KERNEL_OK")
</pallas_src>

<mosaic_0001>
module attributes {stable_mosaic.version = 11 : i64} {
  func.func @kernel(%arg0: i32, %arg1: memref<16x128xf32, #tpu.memory_space<vmem>>, %arg2: memref<128x128xbf16, #tpu.memory_space<vmem>>, %arg3: memref<1x128xf32, #tpu.memory_space<vmem>>, %arg4: memref<128x128xbf16, #tpu.memory_space<vmem>>, %arg5: memref<1x128xf32, #tpu.memory_space<vmem>>, %arg6: memref<128x128xbf16, #tpu.memory_space<vmem>>, %arg7: memref<1x128xf32, #tpu.memory_space<vmem>>, %arg8: memref<16x128xf32, #tpu.memory_space<vmem>>) attributes {dimension_semantics = [#tpu.dimension_semantics<parallel>], iteration_bounds = array<i64: 1>, scalar_prefetch = 0 : i64, scratch_operands = 0 : i64, tpu.core_type = #tpu.core_type<tc>, window_params = [{transform_indices = @transform_0, window_bounds = array<i64: 16, 128>}, {pipeline_mode = #tpu.pipeline_mode<synchronous>, transform_indices = @transform_1, window_bounds = array<i64: 128, 128>}, {pipeline_mode = #tpu.pipeline_mode<synchronous>, transform_indices = @transform_2, window_bounds = array<i64: 1, 128>}, {pipeline_mode = #tpu.pipeline_mode<synchronous>, transform_indices = @transform_3, window_bounds = array<i64: 128, 128>}, {pipeline_mode = #tpu.pipeline_mode<synchronous>, transform_indices = @transform_4, window_bounds = array<i64: 1, 128>}, {pipeline_mode = #tpu.pipeline_mode<synchronous>, transform_indices = @transform_5, window_bounds = array<i64: 128, 128>}, {pipeline_mode = #tpu.pipeline_mode<synchronous>, transform_indices = @transform_6, window_bounds = array<i64: 1, 128>}, {transform_indices = @transform_7, window_bounds = array<i64: 16, 128>}]} {
    %c0 = arith.constant 0 : index
    %c0_0 = arith.constant 0 : index
    %0 = vector.load %arg1[%c0, %c0_0] : memref<16x128xf32, #tpu.memory_space<vmem>>, vector<16x128xf32>
    %1 = arith.truncf %0 : vector<16x128xf32> to vector<16x128xbf16>
    %c0_1 = arith.constant 0 : index
    %c0_2 = arith.constant 0 : index
    %2 = vector.load %arg2[%c0_1, %c0_2] : memref<128x128xbf16, #tpu.memory_space<vmem>>, vector<128x128xbf16>
    %c0_3 = arith.constant 0 : index
    %c0_4 = arith.constant 0 : index
    %3 = vector.load %arg3[%c0_3, %c0_4] : memref<1x128xf32, #tpu.memory_space<vmem>>, vector<1x128xf32>
    %cst = arith.constant dense<0.000000e+00> : vector<16x128xf32>
    %4 = tpu.matmul %1, %2, %cst {dimension_numbers = #tpu.dot_dimension_numbers<[1], [0], [0], [1], [0, 0, 1, 1], [], []>} : vector<16x128xbf16>, vector<128x128xbf16>, vector<16x128xf32> -> vector<16x128xf32>
    %5 = vector.broadcast %3 : vector<1x128xf32> to vector<16x128xf32>
    %6 = arith.addf %4, %5 : vector<16x128xf32>
    %cst_5 = arith.constant 0.000000e+00 : f32
    %7 = vector.broadcast %cst_5 : f32 to vector<16x128xf32>
    %8 = arith.maximumf %6, %7 : vector<16x128xf32>
    %9 = arith.truncf %8 : vector<16x128xf32> to vector<16x128xbf16>
    %c0_6 = arith.constant 0 : index
    %c0_7 = arith.constant 0 : index
    %10 = vector.load %arg4[%c0_6, %c0_7] : memref<128x128xbf16, #tpu.memory_space<vmem>>, vector<128x128xbf16>
    %c0_8 = arith.constant 0 : index
    %c0_9 = arith.constant 0 : index
    %11 = vector.load %arg5[%c0_8, %c0_9] : memref<1x128xf32, #tpu.memory_space<vmem>>, vector<1x128xf32>
    %cst_10 = arith.constant dense<0.000000e+00> : vector<16x128xf32>
    %12 = tpu.matmul %9, %10, %cst_10 {dimension_numbers = #tpu.dot_dimension_numbers<[1], [0], [0], [1], [0, 0, 1, 1], [], []>} : vector<16x128xbf16>, vector<128x128xbf16>, vector<16x128xf32> -> vector<16x128xf32>
    %13 = vector.broadcast %11 : vector<1x128xf32> to vector<16x128xf32>
    %14 = arith.addf %12, %13 : vector<16x128xf32>
    %cst_11 = arith.constant 0.000000e+00 : f32
    %15 = vector.broadcast %cst_11 : f32 to vector<16x128xf32>
    %16 = arith.maximumf %14, %15 : vector<16x128xf32>
    %17 = arith.truncf %16 : vector<16x128xf32> to vector<16x128xbf16>
    %c0_12 = arith.constant 0 : index
    %c0_13 = arith.constant 0 : index
    %18 = vector.load %arg6[%c0_12, %c0_13] : memref<128x128xbf16, #tpu.memory_space<vmem>>, vector<128x128xbf16>
    %c0_14 = arith.constant 0 : index
    %c0_15 = arith.constant 0 : index
    %19 = vector.load %arg7[%c0_14, %c0_15] : memref<1x128xf32, #tpu.memory_space<vmem>>, vector<1x128xf32>
    %cst_16 = arith.constant dense<0.000000e+00> : vector<16x128xf32>
    %20 = tpu.matmul %17, %18, %cst_16 {dimension_numbers = #tpu.dot_dimension_numbers<[1], [0], [0], [1], [0, 0, 1, 1], [], []>} : vector<16x128xbf16>, vector<128x128xbf16>, vector<16x128xf32> -> vector<16x128xf32>
    %21 = vector.broadcast %19 : vector<1x128xf32> to vector<16x128xf32>
    %22 = arith.addf %20, %21 : vector<16x128xf32>
    %c0_17 = arith.constant 0 : index
    %c0_18 = arith.constant 0 : index
    %23 = vector.load %arg8[%c0_17, %c0_18] : memref<16x128xf32, #tpu.memory_space<vmem>>, vector<16x128xf32>
    tpu.vector_store %arg8[%c0_17, %c0_18], %22 {strides = array<i32>} : memref<16x128xf32, #tpu.memory_space<vmem>>, vector<16x128xf32>,
    return
  }
  func.func @transform_0(%arg0: i32) -> (i32, i32) {
    %c0_i32 = arith.constant 0 : i32
    %c0_i32_0 = arith.constant 0 : i32
    return %arg0, %c0_i32 : i32, i32
  }
  func.func @transform_1(%arg0: i32) -> (i32, i32) {
    %c0_i32 = arith.constant 0 : i32
    %c0_i32_0 = arith.constant 0 : i32
    %c0_i32_1 = arith.constant 0 : i32
    return %c0_i32, %c0_i32_0 : i32, i32
  }
  func.func @transform_2(%arg0: i32) -> (i32, i32) {
    %c0_i32 = arith.constant 0 : i32
    %c0_i32_0 = arith.constant 0 : i32
    %c0_i32_1 = arith.constant 0 : i32
    return %c0_i32, %c0_i32_0 : i32, i32
  }
  func.func @transform_3(%arg0: i32) -> (i32, i32) {
    %c0_i32 = arith.constant 0 : i32
    %c0_i32_0 = arith.constant 0 : i32
    %c0_i32_1 = arith.constant 0 : i32
    return %c0_i32, %c0_i32_0 : i32, i32
  }
  func.func @transform_4(%arg0: i32) -> (i32, i32) {
    %c0_i32 = arith.constant 0 : i32
    %c0_i32_0 = arith.constant 0 : i32
    %c0_i32_1 = arith.constant 0 : i32
    return %c0_i32, %c0_i32_0 : i32, i32
  }
  func.func @transform_5(%arg0: i32) -> (i32, i32) {
    %c0_i32 = arith.constant 0 : i32
    %c0_i32_0 = arith.constant 0 : i32
    %c0_i32_1 = arith.constant 0 : i32
    return %c0_i32, %c0_i32_0 : i32, i32
  }
  func.func @transform_6(%arg0: i32) -> (i32, i32) {
    %c0_i32 = arith.constant 0 : i32
    %c0_i32_0 = arith.constant 0 : i32
    %c0_i32_1 = arith.constant 0 : i32
    return %c0_i32, %c0_i32_0 : i32, i32
  }
  func.func @transform_7(%arg0: i32) -> (i32, i32) {
    %c0_i32 = arith.constant 0 : i32
    %c0_i32_0 = arith.constant 0 : i32
    return %arg0, %c0_i32 : i32, i32
  }
}

module attributes {stable_mosaic.version = 11 : i64} {
  func.func @kernel(%arg0: i32, %arg1: memref<16x128xf32, #tpu.memory_space<vmem>>, %arg2: memref<128x128xbf16, #tpu.memory_space<vmem>>, %arg3: memref<1x128xf32, #tpu.memory_space<vmem>>, %arg4: memref<128x128xbf16, #tpu.memory_space<vmem>>, %arg5: memref<1x128xf32, #tpu.memory_space<vmem>>, %arg6: memref<128x128xbf16, #tpu.memory_space<vmem>>, %arg7: memref<1x128xf32, #tpu.memory_space<vmem>>, %arg8: memref<16x128xf32, #tpu.memory_space<vmem>>) attributes {dimension_semantics = [#tpu.dimension_semantics<parallel>], iteration_bounds = array<i64: 1>, scalar_prefetch = 0 : i64, scratch_operands = 0 : i64, tpu.core_type = #tpu.core_type<tc>, window_params = [{transform_indices = @transform_0, window_bounds = array<i64: 16, 128>}, {pipeline_mode = #tpu.pipeline_mode<synchronous>, transform_indices = @transform_1, window_bounds = array<i64: 128, 128>}, {pipeline_mode = #tpu.pipeline_mode<synchronous>, transform_indices = @transform_2, window_bounds = array<i64: 1, 128>}, {pipeline_mode = #tpu.pipeline_mode<synchronous>, transform_indices = @transform_3, window_bounds = array<i64: 128, 128>}, {pipeline_mode = #tpu.pipeline_mode<synchronous>, transform_indices = @transform_4, window_bounds = array<i64: 1, 128>}, {pipeline_mode = #tpu.pipeline_mode<synchronous>, transform_indices = @transform_5, window_bounds = array<i64: 128, 128>}, {pipeline_mode = #tpu.pipeline_mode<synchronous>, transform_indices = @transform_6, window_bounds = array<i64: 1, 128>}, {transform_indices = @transform_7, window_bounds = array<i64: 16, 128>}]} {
    %c0 = arith.constant 0 : index
    %c0_0 = arith.constant 0 : index
    %0 = vector.load %arg1[%c0, %c0_0] : memref<16x128xf32, #tpu.memory_space<vmem>>, vector<16x128xf32>
    %1 = arith.truncf %0 : vector<16x128xf32> to vector<16x128xbf16>
    %c0_1 = arith.constant 0 : index
    %c0_2 = arith.constant 0 : index
    %2 = vector.load %arg2[%c0_1, %c0_2] : memref<128x128xbf16, #tpu.memory_space<vmem>>, vector<128x128xbf16>
    %c0_3 = arith.constant 0 : index
    %c0_4 = arith.constant 0 : index
    %3 = vector.load %arg3[%c0_3, %c0_4] : memref<1x128xf32, #tpu.memory_space<vmem>>, vector<1x128xf32>
    %cst = arith.constant dense<0.000000e+00> : vector<16x128xf32>
    %4 = tpu.matmul %1, %2, %cst {dimension_numbers = #tpu.dot_dimension_numbers<[1], [0], [0], [1], [0, 0, 1, 1], [], []>} : vector<16x128xbf16>, vector<128x128xbf16>, vector<16x128xf32> -> vector<16x128xf32>
    %5 = vector.broadcast %3 : vector<1x128xf32> to vector<16x128xf32>
    %6 = arith.addf %4, %5 : vector<16x128xf32>
    %cst_5 = arith.constant 0.000000e+00 : f32
    %7 = vector.broadcast %cst_5 : f32 to vector<16x128xf32>
    %8 = arith.maximumf %6, %7 : vector<16x128xf32>
    %9 = arith.truncf %8 : vector<16x128xf32> to vector<16x128xbf16>
    %c0_6 = arith.constant 0 : index
    %c0_7 = arith.constant 0 : index
    %10 = vector.load %arg4[%c0_6, %c0_7] : memref<128x128xbf16, #tpu.memory_space<vmem>>, vector<128x128xbf16>
    %c0_8 = arith.constant 0 : index
    %c0_9 = arith.constant 0 : index
    %11 = vector.load %arg5[%c0_8, %c0_9] : memref<1x128xf32, #tpu.memory_space<vmem>>, vector<1x128xf32>
    %cst_10 = arith.constant dense<0.000000e+00> : vector<16x128xf32>
    %12 = tpu.matmul %9, %10, %cst_10 {dimension_numbers = #tpu.dot_dimension_numbers<[1], [0], [0], [1], [0, 0, 1, 1], [], []>} : vector<16x128xbf16>, vector<128x128xbf16>, vector<16x128xf32> -> vector<16x128xf32>
    %13 = vector.broadcast %11 : vector<1x128xf32> to vector<16x128xf32>
    %14 = arith.addf %12, %13 : vector<16x128xf32>
    %cst_11 = arith.constant 0.000000e+00 : f32
    %15 = vector.broadcast %cst_11 : f32 to vector<16x128xf32>
    %16 = arith.maximumf %14, %15 : vector<16x128xf32>
    %17 = arith.truncf %16 : vector<16x128xf32> to vector<16x128xbf16>
    %c0_12 = arith.constant 0 : index
    %c0_13 = arith.constant 0 : index
    %18 = vector.load %arg6[%c0_12, %c0_13] : memref<128x128xbf16, #tpu.memory_space<vmem>>, vector<128x128xbf16>
    %c0_14 = arith.constant 0 : index
    %c0_15 = arith.constant 0 : index
    %19 = vector.load %arg7[%c0_14, %c0_15] : memref<1x128xf32, #tpu.memory_space<vmem>>, vector<1x128xf32>
    %cst_16 = arith.constant dense<0.000000e+00> : vector<16x128xf32>
    %20 = tpu.matmul %17, %18, %cst_16 {dimension_numbers = #tpu.dot_dimension_numbers<[1], [0], [0], [1], [0, 0, 1, 1], [], []>} : vector<16x128xbf16>, vector<128x128xbf16>, vector<16x128xf32> -> vector<16x128xf32>
    %21 = vector.broadcast %19 : vector<1x128xf32> to vector<16x128xf32>
    %22 = arith.addf %20, %21 : vector<16x128xf32>
    %c0_17 = arith.constant 0 : index
    %c0_18 = arith.constant 0 : index
    %23 = vector.load %arg8[%c0_17, %c0_18] : memref<16x128xf32, #tpu.memory_space<vmem>>, vector<16x128xf32>
    tpu.vector_store %arg8[%c0_17, %c0_18], %22 {strides = array<i32>} : memref<16x128xf32, #tpu.memory_space<vmem>>, vector<16x128xf32>,
    return
  }
  func.func @transform_0(%arg0: i32) -> (i32, i32) {
    %c0_i32 = arith.constant 0 : i32
    %c0_i32_0 = arith.constant 0 : i32
    return %arg0, %c0_i32 : i32, i32
  }
  func.func @transform_1(%arg0: i32) -> (i32, i32) {
    %c0_i32 = arith.constant 0 : i32
    %c0_i32_0 = arith.constant 0 : i32
    %c0_i32_1 = arith.constant 0 : i32
    return %c0_i32, %c0_i32_0 : i32, i32
  }
  func.func @transform_2(%arg0: i32) -> (i32, i32) {
    %c0_i32 = arith.constant 0 : i32
    %c0_i32_0 = arith.constant 0 : i32
    %c0_i32_1 = arith.constant 0 : i32
    return %c0_i32, %c0_i32_0 : i32, i32
  }
  func.func @transform_3(%arg0: i32) -> (i32, i32) {
    %c0_i32 = arith.constant 0 : i32
    %c0_i32_0 = arith.constant 0 : i32
    %c0_i32_1 = arith.constant 0 : i32
    return %c0_i32, %c0_i32_0 : i32, i32
  }
  func.func @transform_4(%arg0: i32) -> (i32, i32) {
    %c0_i32 = arith.constant 0 : i32
    %c0_i32_0 = arith.constant 0 : i32
    %c0_i32_1 = arith.constant 0 : i32
    return %c0_i32, %c0_i32_0 : i32, i32
  }
  func.func @transform_5(%arg0: i32) -> (i32, i32) {
    %c0_i32 = arith.constant 0 : i32
    %c0_i32_0 = arith.constant 0 : i32
    %c0_i32_1 = arith.constant 0 : i32
    return %c0_i32, %c0_i32_0 : i32, i32
  }
  func.func @transform_6(%arg0: i32) -> (i32, i32) {
    %c0_i32 = arith.constant 0 : i32
    %c0_i32_0 = arith.constant 0 : i32
    %c0_i32_1 = arith.constant 0 : i32
    return %c0_i32, %c0_i32_0 : i32, i32
  }
  func.func @transform_7(%arg0: i32) -> (i32, i32) {
    %c0_i32 = arith.constant 0 : i32
    %c0_i32_0 = arith.constant 0 : i32
    return %arg0, %c0_i32 : i32, i32
  }
}

</mosaic_0001>

<bundles_post_ra>
// kernel: tpu_custom_call.1
= control target key start
LH: loop header
LB: loop body
LE: loop exit
PB: predicated region body
PF: predicated region fallthrough
CT: control target
= control target key end

     0   :  { %12 = vsyncpa [#allocation3], 0  ;;  %s707_s0 = inlined_call_operand.hbm [shape: f32[16,128], index: 0, kind: input, shape index: {}]   ;;  %s708_s1 = inlined_call_operand.hbm [shape: bf16[128,128], index: 1, kind: input, shape index: {}]   ;;  %s709_s2 = inlined_call_operand.vmem [shape: f32[1,128], index: 2, kind: input, shape index: {}]   ;;  %s710_s3 = inlined_call_operand.hbm [shape: bf16[128,128], index: 3, kind: input, shape index: {}]   ;;  %s711_s4 = inlined_call_operand.vmem [shape: f32[1,128], index: 4, kind: input, shape index: {}]   ;;  %s712_s5 = inlined_call_operand.hbm [shape: bf16[128,128], index: 5, kind: input, shape index: {}]   ;;  %s713_s6 = inlined_call_operand.vmem [shape: f32[1,128], index: 6, kind: input, shape index: {}]   ;;  %s714_s7 = inlined_call_operand.hbm [shape: f32[16,128], index: 7, kind: output, shape index: {}]  }
   0x1   :  { %13 = vsyncpa [#allocation6], 0 }
   0x2   :  { %14 = vsyncpa [#allocation9], 0  ;;  %s33_s26 = sshll.u32 %s708_s1, 4  ;;  %s34_s26 = int_to_ptr.hbm [resolvable:$true] %s33_s26 }
   0x3   :  { %15 = vsyncpa [#allocation4], 0  ;;  %s628_s27 = smov [#allocation5]   ;;  %s20_s8 = sshll.u32 %s707_s0, 4  ;;  %s21_s8 = int_to_ptr.hbm [resolvable:$true] %s20_s8 }
   0x4   :  { %s35_s28 = sshll.u32 %s628_s27, 4  ;;  %s629_s9 = smov 64   ;;  %s36_s28 = int_to_ptr.vmem [resolvable:$true] %s35_s28 }
   0x5   :  { %s630_s10 = smov 4   ;;  %s631_s11 = smov [#allocation2]  }
   0x6   :  { %41 = dma.hbm_to_vmem [thread:$0]  %s34_s26, 1024, %s36_s28, [#allocation6], %s629_s9, %s629_s9, %s630_s10  }
   0x7   :  { %s22_s12 = sshll.u32 %s631_s11, 4  ;;  %s632_s13 = smov 128   ;;  %s23_s12 = int_to_ptr.vmem [resolvable:$true] %s22_s12 }
   0x8   :  { %s633_s14 = smov 8   ;;  %s48_s16 = sshll.u32 %s710_s3, 4  ;;  %s49_s16 = int_to_ptr.hbm [resolvable:$true] %s48_s16 }
   0x9   :  { %28 = dma.hbm_to_vmem [thread:$0]  %s21_s8, 256, %s23_s12, [#allocation3], %s632_s13, %s632_s13, %s633_s14  }
   0xa   :  { %s634_s17 = smov [#allocation7]   ;;  %s63_s20 = sshll.u32 %s712_s5, 4  ;;  %s64_s20 = int_to_ptr.hbm [resolvable:$true] %s63_s20 }
   0xb   :  { %s50_s0 = sshll.u32 %s634_s17, 4  ;;  %s635_s21 = smov [#allocation8]   ;;  %s51_s0 = int_to_ptr.vmem [resolvable:$true] %s50_s0 }
   0xc   :  { %56 = dma.hbm_to_vmem [thread:$0]  %s49_s16, 1024, %s51_s0, [#allocation6], %s629_s9, %s629_s9, %s630_s10  }
   0xd   :  { %s65_s22 = sshll.u32 %s635_s21, 4  ;;  %s66_s22 = int_to_ptr.vmem [resolvable:$true] %s65_s22 }
   0xe   :  { %71 = dma.hbm_to_vmem [thread:$0]  %s64_s20, 1024, %s66_s22, [#allocation9], %s629_s9, %s629_s9, %s630_s10  }
   0xf   :  { %620 = dma.done.wait [#allocation3], 256  }
  0x10   :  { %621 = vsyncadd [#allocation3], 4294967040 }
  0x11   :  { %622 = dma.done.wait [#allocation6], 2048  }
  0x12   :  { %623 = vsyncadd [#allocation6], 4294965248 }
  0x13   :  { %624 = dma.done.wait [#allocation9], 1024  }
  0x14   :  { %625 = vsyncadd [#allocation9], 4294966272  ;;  %v471_v0 = vld [vmem:[#allocation5 + $0x38] sm:$0xff]  ;;  %v470_v1 = vld [vmem:[#allocation5 + $0x30] sm:$0xff]  ;;  %s636_s26 = smov [#allocation10]  }
  0x15   :  { %161 = vmatpush.bf16.msra.mxu0 %v471_v0  ;;  %v479_v2 = vld [vmem:[#allocation7 + $0x38] sm:$0xff]  ;;  %v478_v3 = vld [vmem:[#allocation7 + $0x30] sm:$0xff]  ;;  %v469_v4 = vld [vmem:[#allocation5 + $0x28] sm:$0xff]  ;;  %s351_s27 = sshll.u32 %s636_s26, 4  ;;  %s352_s27 = int_to_ptr.vmem [resolvable:$true] %s351_s27 }
  0x16   :  { %246 = vmatpush.bf16.msra.mxu1 %v479_v2  ;;  %v477_v5 = vld [vmem:[#allocation7 + $0x28] sm:$0xff]  ;;  %v468_v6 = vld [vmem:[#allocation5 + $0x20] sm:$0xff]  ;;  %v467_v8 = vld [vmem:[#allocation5 + $0x18] sm:$0xff] }
  0x17   :  { %v476_v7 = vld [vmem:[#allocation7 + $0x20] sm:$0xff]  ;;  %v466_v9 = vld [vmem:[#allocation5 + $0x10] sm:$0xff]  ;;  %v465_v10 = vld [vmem:[#allocation5 + $0x8] sm:$0xff] }
  0x18   :  { %v464_v11 = vld [vmem:[#allocation5] sm:$0xff]  ;;  %v90_v12 = vld [vmem:[#allocation2] sm:$0xff]  ;;  %v91_v13 = vld [vmem:[#allocation2 + $0x8] sm:$0xff] }
  0x19   :  { %162 = vmatpush.bf16.msra.mxu0 %v470_v1  ;;  %v92_v14 = vpack.c.bf16 %v91_v13, %v90_v12  ;;  %v475_v15 = vld [vmem:[#allocation7 + $0x18] sm:$0xff]  ;;  %v474_v16 = vld [vmem:[#allocation7 + $0x10] sm:$0xff]  ;;  %v473_v17 = vld [vmem:[#allocation7 + $0x8] sm:$0xff] }
  0x1a   :  { %247 = vmatpush.bf16.msra.mxu1 %v478_v3  ;;  %v472_v18 = vld [vmem:[#allocation7] sm:$0xff]  ;;  %v487_v19 = vld [vmem:[#allocation8 + $0x38] sm:$0xff]  ;;  %v486_v20 = vld [vmem:[#allocation8 + $0x30] sm:$0xff] }
  0x1b   :  { %331 = vmatpush.bf16.msra.mxu2 %v487_v19  ;;  %v485_v21 = vld [vmem:[#allocation8 + $0x28] sm:$0xff]  ;;  %v484_v22 = vld [vmem:[#allocation8 + $0x20] sm:$0xff]  ;;  %v497_v24 = vld [vmem:[%s709_s2] ss:$0 sm:$0xff] }
  0x1c   :  { %v483_v31 = vld [vmem:[#allocation8 + $0x18] sm:$0xff]  ;;  %v482_v32 = vld [vmem:[#allocation8 + $0x10] sm:$0xff]  ;;  %v481_v33 = vld [vmem:[#allocation8 + $0x8] sm:$0xff] }
  0x1d   :  { %163 = vmatpush.bf16.msra.mxu0 %v469_v4  ;;  %v480_v34 = vld [vmem:[#allocation8] sm:$0xff]  ;;  %v498_v36 = vld [vmem:[%s711_s4] ss:$0 sm:$0xff]  ;;  %s353_s4 = sshll.u32 %s714_s7, 4  ;;  %s354_s4 = int_to_ptr.hbm [resolvable:$true] %s353_s4 }
  0x1e   :  { %248 = vmatpush.bf16.msra.mxu1 %v477_v5  ;;  %v499_v43 = vld [vmem:[%s713_s6] ss:$0 sm:$0xff] }
  0x1f   :  { %332 = vmatpush.bf16.msra.mxu2 %v486_v20 }
  0x21   :  { %164 = vmatpush.bf16.msra.mxu0 %v468_v6 }
  0x22   :  { %249 = vmatpush.bf16.msra.mxu1 %v476_v7 }
  0x23   :  { %333 = vmatpush.bf16.msra.mxu2 %v485_v21 }
  0x25   :  { %165 = vmatpush.bf16.msra.mxu0 %v467_v8 }
  0x26   :  { %250 = vmatpush.bf16.msra.mxu1 %v475_v15 }
  0x27   :  { %334 = vmatpush.bf16.msra.mxu2 %v484_v22 }
  0x29   :  { %166 = vmatpush.bf16.msra.mxu0 %v466_v9 }
  0x2a   :  { %251 = vmatpush.bf16.msra.mxu1 %v474_v16 }
  0x2b   :  { %335 = vmatpush.bf16.msra.mxu2 %v483_v31 }
  0x2d   :  { %167 = vmatpush.bf16.msra.mxu0 %v465_v10 }
  0x2e   :  { %252 = vmatpush.bf16.msra.mxu1 %v473_v17 }
  0x2f   :  { %336 = vmatpush.bf16.msra.mxu2 %v482_v32 }
  0x31   :  { %168 = vmatpush.bf16.msra.mxu0 %v464_v11 }
  0x32   :  { %253 = vmatpush.bf16.msra.mxu1 %v472_v18 }
  0x33   :  { %337 = vmatpush.bf16.msra.mxu2 %v481_v33 }
  0x34   :  { %169 = vmatmul.bf16.vlgmr.msra.gmra.mxu0 %v92_v14 }
  0x37   :  { %338 = vmatpush.bf16.msra.mxu2 %v480_v34 }
  0xb1   :  { %v170_v23 = vpop.f32.mrf.mxu0 }
  0xb2   :  { %v171_v25 = vadd.f32 %v497_v24, %v170_v23 }
  0xb4   :  { %v175_v28 = vmax.f32 %v171_v25, 0.0 }
  0xb9   :  { %v172_v26 = vpop.f32.mrf.mxu0 }
  0xba   :  { %v173_v27 = vadd.f32 %v497_v24, %v172_v26 }
  0xbc   :  { %v176_v29 = vmax.f32 %v173_v27, 0.0 }
  0xbe   :  { %v177_v30 = vpack.c.bf16 %v176_v29, %v175_v28 }
  0xc0   :  { %254 = vmatmul.bf16.vlgmr.msra.gmra.mxu1 %v177_v30 }
 0x13d   :  { %v255_v35 = vpop.f32.mrf.mxu1 }
 0x13e   :  { %v256_v37 = vadd.f32 %v498_v36, %v255_v35 }
 0x140   :  { %v260_v40 = vmax.f32 %v256_v37, 0.0 }
 0x145   :  { %v257_v38 = vpop.f32.mrf.mxu1 }
 0x146   :  { %v258_v39 = vadd.f32 %v498_v36, %v257_v38 }
 0x148   :  { %v261_v41 = vmax.f32 %v258_v39, 0.0 }
 0x14a   :  { %v262_v42 = vpack.c.bf16 %v261_v41, %v260_v40 }
 0x14c   :  { %339 = vmatmul.bf16.vlgmr.msra.gmra.mxu2 %v262_v42 }
 0x1cf   :  { %v340_v44 = vpop.f32.mrf.mxu2 }
 0x1d0   :  { %v341_v45 = vadd.f32 %v499_v43, %v340_v44 }
 0x1d2   :  { %345 = vst [vmem:[#allocation10] sm:$0xff] %v341_v45 }
 0x1d7   :  { %v342_v46 = vpop.f32.mrf.mxu2 }
 0x1d8   :  { %v343_v47 = vadd.f32 %v499_v43, %v342_v46 }
 0x1da   :  { %346 = vst [vmem:[#allocation10 + $0x8] sm:$0xff] %v343_v47 }
 0x1db   :  { %359 = dma.vmem_to_hbm [thread:$0]  %s352_s27, 256, %s354_s4, [#allocation4], %s632_s13, %s632_s13, %s633_s14  }
 0x1dc   :  { %626 = dma.done.wait [#allocation4], 256  }
 0x1dd   :  { %627 = vsyncadd [#allocation4], 4294967040 }
 0x1de   :  { %364 = vsyncpa [#allocation3], 1 }
 0x1df   :  { %365 = vsyncpa [#allocation6], 1 }
 0x1e0   :  { %366 = vsyncpa [#allocation9], 1 }
 0x1e1   :  { %367 = vsyncpa [#allocation4], 1 }

// kernel: tpu_custom_call.1
= control target key start
LH: loop header
LB: loop body
LE: loop exit
PB: predicated region body
PF: predicated region fallthrough
CT: control target
= control target key end

     0   :  { %12 = vsyncpa [#allocation3], 0  ;;  %s707_s0 = inlined_call_operand.hbm [shape: f32[16,128], index: 0, kind: input, shape index: {}]   ;;  %s708_s1 = inlined_call_operand.hbm [shape: bf16[128,128], index: 1, kind: input, shape index: {}]   ;;  %s709_s2 = inlined_call_operand.vmem [shape: f32[1,128], index: 2, kind: input, shape index: {}]   ;;  %s710_s3 = inlined_call_operand.hbm [shape: bf16[128,128], index: 3, kind: input, shape index: {}]   ;;  %s711_s4 = inlined_call_operand.vmem [shape: f32[1,128], index: 4, kind: input, shape index: {}]   ;;  %s712_s5 = inlined_call_operand.hbm [shape: bf16[128,128], index: 5, kind: input, shape index: {}]   ;;  %s713_s6 = inlined_call_operand.vmem [shape: f32[1,128], index: 6, kind: input, shape index: {}]   ;;  %s714_s7 = inlined_call_operand.hbm [shape: f32[16,128], index: 7, kind: output, shape index: {}]  }
   0x1   :  { %13 = vsyncpa [#allocation6], 0 }
   0x2   :  { %14 = vsyncpa [#allocation9], 0  ;;  %s33_s26 = sshll.u32 %s708_s1, 4  ;;  %s34_s26 = int_to_ptr.hbm [resolvable:$true] %s33_s26 }
   0x3   :  { %15 = vsyncpa [#allocation4], 0  ;;  %s628_s27 = smov [#allocation5]   ;;  %s20_s8 = sshll.u32 %s707_s0, 4  ;;  %s21_s8 = int_to_ptr.hbm [resolvable:$true] %s20_s8 }
   0x4   :  { %s35_s28 = sshll.u32 %s628_s27, 4  ;;  %s629_s9 = smov 64   ;;  %s36_s28 = int_to_ptr.vmem [resolvable:$true] %s35_s28 }
   0x5   :  { %s630_s10 = smov 4   ;;  %s631_s11 = smov [#allocation2]  }
   0x6   :  { %41 = dma.hbm_to_vmem [thread:$0]  %s34_s26, 1024, %s36_s28, [#allocation6], %s629_s9, %s629_s9, %s630_s10  }
   0x7   :  { %s22_s12 = sshll.u32 %s631_s11, 4  ;;  %s632_s13 = smov 128   ;;  %s23_s12 = int_to_ptr.vmem [resolvable:$true] %s22_s12 }
   0x8   :  { %s633_s14 = smov 8   ;;  %s48_s16 = sshll.u32 %s710_s3, 4  ;;  %s49_s16 = int_to_ptr.hbm [resolvable:$true] %s48_s16 }
   0x9   :  { %28 = dma.hbm_to_vmem [thread:$0]  %s21_s8, 256, %s23_s12, [#allocation3], %s632_s13, %s632_s13, %s633_s14  }
   0xa   :  { %s634_s17 = smov [#allocation7]   ;;  %s63_s20 = sshll.u32 %s712_s5, 4  ;;  %s64_s20 = int_to_ptr.hbm [resolvable:$true] %s63_s20 }
   0xb   :  { %s50_s0 = sshll.u32 %s634_s17, 4  ;;  %s635_s21 = smov [#allocation8]   ;;  %s51_s0 = int_to_ptr.vmem [resolvable:$true] %s50_s0 }
   0xc   :  { %56 = dma.hbm_to_vmem [thread:$0]  %s49_s16, 1024, %s51_s0, [#allocation6], %s629_s9, %s629_s9, %s630_s10  }
   0xd   :  { %s65_s22 = sshll.u32 %s635_s21, 4  ;;  %s66_s22 = int_to_ptr.vmem [resolvable:$true] %s65_s22 }
   0xe   :  { %71 = dma.hbm_to_vmem [thread:$0]  %s64_s20, 1024, %s66_s22, [#allocation9], %s629_s9, %s629_s9, %s630_s10  }
   0xf   :  { %620 = dma.done.wait [#allocation3], 256  }
  0x10   :  { %621 = vsyncadd [#allocation3], 4294967040 }
  0x11   :  { %622 = dma.done.wait [#allocation6], 2048  }
  0x12   :  { %623 = vsyncadd [#allocation6], 4294965248 }
  0x13   :  { %624 = dma.done.wait [#allocation9], 1024  }
  0x14   :  { %625 = vsyncadd [#allocation9], 4294966272  ;;  %v471_v0 = vld [vmem:[#allocation5 + $0x38] sm:$0xff]  ;;  %v470_v1 = vld [vmem:[#allocation5 + $0x30] sm:$0xff]  ;;  %s636_s26 = smov [#allocation10]  }
  0x15   :  { %161 = vmatpush.bf16.msra.mxu0 %v471_v0  ;;  %v479_v2 = vld [vmem:[#allocation7 + $0x38] sm:$0xff]  ;;  %v478_v3 = vld [vmem:[#allocation7 + $0x30] sm:$0xff]  ;;  %v469_v4 = vld [vmem:[#allocation5 + $0x28] sm:$0xff]  ;;  %s351_s27 = sshll.u32 %s636_s26, 4  ;;  %s352_s27 = int_to_ptr.vmem [resolvable:$true] %s351_s27 }
  0x16   :  { %246 = vmatpush.bf16.msra.mxu1 %v479_v2  ;;  %v477_v5 = vld [vmem:[#allocation7 + $0x28] sm:$0xff]  ;;  %v468_v6 = vld [vmem:[#allocation5 + $0x20] sm:$0xff]  ;;  %v467_v8 = vld [vmem:[#allocation5 + $0x18] sm:$0xff] }
  0x17   :  { %v476_v7 = vld [vmem:[#allocation7 + $0x20] sm:$0xff]  ;;  %v466_v9 = vld [vmem:[#allocation5 + $0x10] sm:$0xff]  ;;  %v465_v10 = vld [vmem:[#allocation5 + $0x8] sm:$0xff] }
  0x18   :  { %v464_v11 = vld [vmem:[#allocation5] sm:$0xff]  ;;  %v90_v12 = vld [vmem:[#allocation2] sm:$0xff]  ;;  %v91_v13 = vld [vmem:[#allocation2 + $0x8] sm:$0xff] }
  0x19   :  { %162 = vmatpush.bf16.msra.mxu0 %v470_v1  ;;  %v92_v14 = vpack.c.bf16 %v91_v13, %v90_v12  ;;  %v475_v15 = vld [vmem:[#allocation7 + $0x18] sm:$0xff]  ;;  %v474_v16 = vld [vmem:[#allocation7 + $0x10] sm:$0xff]  ;;  %v473_v17 = vld [vmem:[#allocation7 + $0x8] sm:$0xff] }
  0x1a   :  { %247 = vmatpush.bf16.msra.mxu1 %v478_v3  ;;  %v472_v18 = vld [vmem:[#allocation7] sm:$0xff]  ;;  %v487_v19 = vld [vmem:[#allocation8 + $0x38] sm:$0xff]  ;;  %v486_v20 = vld [vmem:[#allocation8 + $0x30] sm:$0xff] }
  0x1b   :  { %331 = vmatpush.bf16.msra.mxu2 %v487_v19  ;;  %v485_v21 = vld [vmem:[#allocation8 + $0x28] sm:$0xff]  ;;  %v484_v22 = vld [vmem:[#allocation8 + $0x20] sm:$0xff]  ;;  %v497_v24 = vld [vmem:[%s709_s2] ss:$0 sm:$0xff] }
  0x1c   :  { %v483_v31 = vld [vmem:[#allocation8 + $0x18] sm:$0xff]  ;;  %v482_v32 = vld [vmem:[#allocation8 + $0x10] sm:$0xff]  ;;  %v481_v33 = vld [vmem:[#allocation8 + $0x8] sm:$0xff] }
  0x1d   :  { %163 = vmatpush.bf16.msra.mxu0 %v469_v4  ;;  %v480_v34 = vld [vmem:[#allocation8] sm:$0xff]  ;;  %v498_v36 = vld [vmem:[%s711_s4] ss:$0 sm:$0xff]  ;;  %s353_s4 = sshll.u32 %s714_s7, 4  ;;  %s354_s4 = int_to_ptr.hbm [resolvable:$true] %s353_s4 }
  0x1e   :  { %248 = vmatpush.bf16.msra.mxu1 %v477_v5  ;;  %v499_v43 = vld [vmem:[%s713_s6] ss:$0 sm:$0xff] }
  0x1f   :  { %332 = vmatpush.bf16.msra.mxu2 %v486_v20 }
  0x21   :  { %164 = vmatpush.bf16.msra.mxu0 %v468_v6 }
  0x22   :  { %249 = vmatpush.bf16.msra.mxu1 %v476_v7 }
  0x23   :  { %333 = vmatpush.bf16.msra.mxu2 %v485_v21 }
  0x25   :  { %165 = vmatpush.bf16.msra.mxu0 %v467_v8 }
  0x26   :  { %250 = vmatpush.bf16.msra.mxu1 %v475_v15 }
  0x27   :  { %334 = vmatpush.bf16.msra.mxu2 %v484_v22 }
  0x29   :  { %166 = vmatpush.bf16.msra.mxu0 %v466_v9 }
  0x2a   :  { %251 = vmatpush.bf16.msra.mxu1 %v474_v16 }
  0x2b   :  { %335 = vmatpush.bf16.msra.mxu2 %v483_v31 }
  0x2d   :  { %167 = vmatpush.bf16.msra.mxu0 %v465_v10 }
  0x2e   :  { %252 = vmatpush.bf16.msra.mxu1 %v473_v17 }
  0x2f   :  { %336 = vmatpush.bf16.msra.mxu2 %v482_v32 }
  0x31   :  { %168 = vmatpush.bf16.msra.mxu0 %v464_v11 }
  0x32   :  { %253 = vmatpush.bf16.msra.mxu1 %v472_v18 }
  0x33   :  { %337 = vmatpush.bf16.msra.mxu2 %v481_v33 }
  0x34   :  { %169 = vmatmul.bf16.vlgmr.msra.gmra.mxu0 %v92_v14 }
  0x37   :  { %338 = vmatpush.bf16.msra.mxu2 %v480_v34 }
  0xb1   :  { %v170_v23 = vpop.f32.mrf.mxu0 }
  0xb2   :  { %v171_v25 = vadd.f32 %v497_v24, %v170_v23 }
  0xb4   :  { %v175_v28 = vmax.f32 %v171_v25, 0.0 }
  0xb9   :  { %v172_v26 = vpop.f32.mrf.mxu0 }
  0xba   :  { %v173_v27 = vadd.f32 %v497_v24, %v172_v26 }
  0xbc   :  { %v176_v29 = vmax.f32 %v173_v27, 0.0 }
  0xbe   :  { %v177_v30 = vpack.c.bf16 %v176_v29, %v175_v28 }
  0xc0   :  { %254 = vmatmul.bf16.vlgmr.msra.gmra.mxu1 %v177_v30 }
 0x13d   :  { %v255_v35 = vpop.f32.mrf.mxu1 }
 0x13e   :  { %v256_v37 = vadd.f32 %v498_v36, %v255_v35 }
 0x140   :  { %v260_v40 = vmax.f32 %v256_v37, 0.0 }
 0x145   :  { %v257_v38 = vpop.f32.mrf.mxu1 }
 0x146   :  { %v258_v39 = vadd.f32 %v498_v36, %v257_v38 }
 0x148   :  { %v261_v41 = vmax.f32 %v258_v39, 0.0 }
 0x14a   :  { %v262_v42 = vpack.c.bf16 %v261_v41, %v260_v40 }
 0x14c   :  { %339 = vmatmul.bf16.vlgmr.msra.gmra.mxu2 %v262_v42 }
 0x1cf   :  { %v340_v44 = vpop.f32.mrf.mxu2 }
 0x1d0   :  { %v341_v45 = vadd.f32 %v499_v43, %v340_v44 }
 0x1d2   :  { %345 = vst [vmem:[#allocation10] sm:$0xff] %v341_v45 }
 0x1d7   :  { %v342_v46 = vpop.f32.mrf.mxu2 }
 0x1d8   :  { %v343_v47 = vadd.f32 %v499_v43, %v342_v46 }
 0x1da   :  { %346 = vst [vmem:[#allocation10 + $0x8] sm:$0xff] %v343_v47 }
 0x1db   :  { %359 = dma.vmem_to_hbm [thread:$0]  %s352_s27, 256, %s354_s4, [#allocation4], %s632_s13, %s632_s13, %s633_s14  }
 0x1dc   :  { %626 = dma.done.wait [#allocation4], 256  }
 0x1dd   :  { %627 = vsyncadd [#allocation4], 4294967040 }
 0x1de   :  { %364 = vsyncpa [#allocation3], 1 }
 0x1df   :  { %365 = vsyncpa [#allocation6], 1 }
 0x1e0   :  { %366 = vsyncpa [#allocation9], 1 }
 0x1e1   :  { %367 = vsyncpa [#allocation4], 1 }

</bundles_post_ra>
